<compile_context>
chip_gen: v5e
topology: v5e:2x2
jax: 0.10.0
libtpu: 0.0.40
codegen_flags: <defaults>
</compile_context>

<pallas_src>
import jax
import jax.numpy as jnp
from jax.experimental import pallas as pl
from jax.experimental.pallas import tpu as pltpu

_SMALL_INPUT_BYTES = 2 * 1024 * 1024       # below this, plain jnp.sqrt wins
_TARGET_BLOCK_BYTES = 4 * 1024 * 1024      # ~4 MiB per block (per buffer)
_VMEM_LIMIT_BYTES = 40 * 1024 * 1024       # 4 bufs x 4 MiB + headroom, < 64 MiB v7x
_LANE_CHOICES = (1024, 512, 256, 128)      # lane-dense slab widths, widest first


def _sqrt_kernel(y_ref, o_ref):
    # elementwise sqrt on the whole VMEM tile
    o_ref[...] = jnp.sqrt(y_ref[...])


def _round_up(x, m):
    return pl.cdiv(x, m) * m


def _run_sqrt_2d(y2d, rows, lanes, row_unit, itemsize, dtype):
    """pallas_call over a (rows, lanes) slab; rows may be ragged wrt the block."""
    max_rows = max(
        row_unit,
        (_TARGET_BLOCK_BYTES // (lanes * itemsize)) // row_unit * row_unit,
    )
    if rows <= row_unit:
        # single full block: block dim == array dim is always a legal shape
        tile_rows = rows
    else:
        # aim for >= 2 grid steps so v7x can split blocks across both TCs;
        # large inputs are capped at the ~4 MiB byte-targeted block size.
        tile_rows = min(max_rows, _round_up(pl.cdiv(rows, 2), row_unit))
    grid = (pl.cdiv(rows, tile_rows),)

    return pl.pallas_call(
        _sqrt_kernel,
        out_shape=jax.ShapeDtypeStruct((rows, lanes), dtype),
        grid_spec=pltpu.PrefetchScalarGridSpec(
            num_scalar_prefetch=0,
            grid=grid,
            in_specs=[pl.BlockSpec((tile_rows, lanes), lambda i: (i, 0))],
            out_specs=pl.BlockSpec((tile_rows, lanes), lambda i: (i, 0)),
        ),
        compiler_params=pltpu.CompilerParams(
            dimension_semantics=(pltpu.PARALLEL,),
            vmem_limit_bytes=_VMEM_LIMIT_BYTES,
        ),
        cost_estimate=pl.CostEstimate(
            flops=0,
            transcendentals=rows * lanes,
            bytes_accessed=2 * rows * lanes * itemsize,
        ),
    )(y2d)


def sqrt_forward(y, *, min_pallas_bytes=_SMALL_INPUT_BYTES):
    """Pallas implementation of SQRT.forward: elementwise sqrt of y."""
    orig_shape = y.shape
    dtype = y.dtype
    n = y.size
    itemsize = jnp.dtype(dtype).itemsize

    # Escape hatch: tiny inputs are cheaper as a plain fused XLA op.
    if n == 0 or n * itemsize < min_pallas_bytes:
        return jnp.sqrt(y)

    # Sublane granularity depends on dtype packing (f32: 8, bf16: 16, i8: 32).
    row_unit = max(8, 32 // itemsize)
    flat = y.reshape(-1)

    # Common path: widest lane count that divides numel exactly -> no pad and no
    # post-slice copy; a ragged last row-block is masked by Pallas (reads padded,
    # writes masked), never indexed manually.
    lanes = next((l for l in _LANE_CHOICES if n % l == 0), None)
    if lanes is not None:
        rows = n // lanes
        out2d = _run_sqrt_2d(
            flat.reshape(rows, lanes), rows, lanes, row_unit, itemsize, dtype
        )
        return out2d.reshape(orig_shape)

    # Rare fallback (numel % 128 != 0): minimal pad to the lane boundary + a
    # post-slice.  Zero padding is safe for sqrt (sqrt(0) = 0).
    lanes = 128
    padded_n = _round_up(n, lanes)
    flat = jnp.pad(flat, (0, padded_n - n))
    rows = padded_n // lanes
    out2d = _run_sqrt_2d(
        flat.reshape(rows, lanes), rows, lanes, row_unit, itemsize, dtype
    )
    return out2d.reshape(-1)[:n].reshape(orig_shape)


class SQRTPallas:
    """JAX/Pallas mirror of the PyTorch SQRT transform."""

    def __init__(self, n_dimensions=1, eps=1e-12):
        self.eps = eps  # no learnable parameters; eps unused in forward (matches reference)

    def forward(self, y):
        return sqrt_forward(y)

    def inv(self, x):
        return x ** 2

    def log_abs_det_jacobian(self, y):
        return -jnp.log(2.0) - 0.5 * jnp.log(y + self.eps)


if __name__ == "__main__":
    key = jax.random.PRNGKey(0)

    # small NCHW-like input, values strictly positive (domain of sqrt)
    y_small = jax.random.uniform(
        key, (2, 4, 16, 16), dtype=jnp.float32, minval=0.1, maxval=4.0
    )
    ref = jnp.sqrt(y_small)

    # 1) force the Pallas path on the small demo shape (it would otherwise take
    #    the XLA escape hatch)
    out = jax.block_until_ready(sqrt_forward(y_small, min_pallas_bytes=0))
    assert out.shape == y_small.shape and out.dtype == y_small.dtype
    assert jnp.allclose(out, ref, atol=1e-6, rtol=1e-6)

    # 2) default module path (escape hatch for tiny tensors) also matches
    mod = SQRTPallas()
    out2 = jax.block_until_ready(mod.forward(y_small))
    assert jnp.allclose(out2, ref, atol=1e-6, rtol=1e-6)

    # 3) medium input: numel divisible by 1024 -> no pad/slice; multi-step grid
    #    with a ragged, Pallas-masked last block
    y_med = jax.random.uniform(
        jax.random.PRNGKey(1), (2, 4, 128, 513), dtype=jnp.float32,
        minval=0.1, maxval=4.0,
    )
    out3 = jax.block_until_ready(sqrt_forward(y_med))
    assert jnp.allclose(out3, jnp.sqrt(y_med), atol=1e-6, rtol=1e-6)

    # 4) odd element count (numel % 128 != 0) exercises the rare pad fallback
    y_odd = jax.random.uniform(
        jax.random.PRNGKey(2), (3, 5, 7, 11), dtype=jnp.float32,
        minval=0.1, maxval=4.0,
    )
    out4 = jax.block_until_ready(sqrt_forward(y_odd, min_pallas_bytes=0))
    assert jnp.allclose(out4, jnp.sqrt(y_odd), atol=1e-6, rtol=1e-6)

    print("KERNEL_OK")
</pallas_src>

<mosaic_0001>
module attributes {stable_mosaic.version = 11 : i64} {
  func.func @_sqrt_kernel(%arg0: i32, %arg1: memref<2x1024xf32, #tpu.memory_space<vmem>>, %arg2: memref<2x1024xf32, #tpu.memory_space<vmem>>) attributes {dimension_semantics = [#tpu.dimension_semantics<parallel>], iteration_bounds = array<i64: 1>, scalar_prefetch = 0 : i64, scratch_operands = 0 : i64, tpu.core_type = #tpu.core_type<tc>, window_params = [{transform_indices = @transform_0, window_bounds = array<i64: 2, 1024>}, {transform_indices = @transform_1, window_bounds = array<i64: 2, 1024>}]} {
    %c0 = arith.constant 0 : index
    %c0_0 = arith.constant 0 : index
    %0 = vector.load %arg1[%c0, %c0_0] : memref<2x1024xf32, #tpu.memory_space<vmem>>, vector<2x1024xf32>
    %1 = math.sqrt %0 : vector<2x1024xf32>
    %c0_1 = arith.constant 0 : index
    %c0_2 = arith.constant 0 : index
    %2 = vector.load %arg2[%c0_1, %c0_2] : memref<2x1024xf32, #tpu.memory_space<vmem>>, vector<2x1024xf32>
    tpu.vector_store %arg2[%c0_1, %c0_2], %1 {strides = array<i32>} : memref<2x1024xf32, #tpu.memory_space<vmem>>, vector<2x1024xf32>,
    return
  }
  func.func @transform_0(%arg0: i32) -> (i32, i32) {
    %c0_i32 = arith.constant 0 : i32
    %c0_i32_0 = arith.constant 0 : i32
    return %arg0, %c0_i32 : i32, i32
  }
  func.func @transform_1(%arg0: i32) -> (i32, i32) {
    %c0_i32 = arith.constant 0 : i32
    %c0_i32_0 = arith.constant 0 : i32
    return %arg0, %c0_i32 : i32, i32
  }
}

</mosaic_0001>

<bundles_post_ra>
// kernel: tpu_custom_call.1
= control target key start
LH: loop header
LB: loop body
LE: loop exit
PB: predicated region body
PF: predicated region fallthrough
CT: control target
= control target key end

     0   :  { %6 = vsyncpa [#allocation3], 0  ;;  %s144_s0 = inlined_call_operand.hbm [shape: f32[2,1024], index: 0, kind: input, shape index: {}]   ;;  %s145_s1 = inlined_call_operand.hbm [shape: f32[2,1024], index: 1, kind: output, shape index: {}]  }
   0x1   :  { %7 = vsyncpa [#allocation4], 0  ;;  %s13_s8 = sshll.u32 %s144_s0, 4  ;;  %s126_s9 = smov [#allocation2]   ;;  %s14_s8 = int_to_ptr.hbm [resolvable:$true] %s13_s8 }
   0x2   :  { %s15_s10 = sshll.u32 %s126_s9, 4  ;;  %s16_s10 = int_to_ptr.vmem [resolvable:$true] %s15_s10 }
   0x3   :  { %18 = dma.hbm_to_vmem [thread:$0]  %s14_s8, 256, %s16_s10, [#allocation3]  }
   0x4   :  { %122 = dma.done.wait [#allocation3], 256  }
   0x5   :  { %123 = vsyncadd [#allocation3], 4294967040  ;;  %v23_v0 = vld [vmem:[#allocation2] sm:$0xff]  ;;  %v24_v1 = vld [vmem:[#allocation2 + $0x8] sm:$0xff]  ;;  %s127_s0 = smov [#allocation5]   ;;  %s58_s14 = sshll.u32 %s145_s1, 4  ;;  %s59_s14 = int_to_ptr.hbm [resolvable:$true] %s58_s14 }
   0x6   :  { %70 = vrsqrt.f32 %v23_v0  ;;  %vm32_vm0 = vcmp.eq.f32.partialorder %v23_v0, inf  ;;  %v35_v13 = vand.u32 2147483648, %v23_v0  ;;  %vm34_vm1 = vcmp.eq.f32.partialorder %v23_v0, 0.0  ;;  %s56_s11 = sshll.u32 %s127_s0, 4  ;;  %s57_s11 = int_to_ptr.vmem [resolvable:$true] %s56_s11 }
   0x7   :  { %72 = vrsqrt.f32 %v24_v1  ;;  %vm44_vm2 = vcmp.eq.f32.partialorder %v24_v1, inf  ;;  %v47_v16 = vand.u32 2147483648, %v24_v1  ;;  %vm46_vm3 = vcmp.eq.f32.partialorder %v24_v1, 0.0 }
   0xc   :  { %v71_v2 = vpop.eup %70 }
   0xd   :  { %v73_v3 = vpop.eup %72  ;;  %v26_v4 = vmul.f32 %v71_v2, %v23_v0 }
   0xe   :  { %v38_v5 = vmul.f32 %v73_v3, %v24_v1 }
   0xf   :  { %v27_v6 = vmul.f32 %v71_v2, %v26_v4 }
  0x10   :  { %v39_v7 = vmul.f32 %v73_v3, %v38_v5 }
  0x11   :  { %v28_v8 = vmul.f32 0.5, %v27_v6 }
  0x12   :  { %v40_v9 = vmul.f32 0.5, %v39_v7 }
  0x13   :  { %v29_v10 = vsub.f32 1.5, %v28_v8 }
  0x14   :  { %v41_v11 = vsub.f32 1.5, %v40_v9 }
  0x15   :  { %v30_v12 = vmul.f32 %v71_v2, %v29_v10 }
  0x16   :  { %v42_v14 = vmul.f32 %v73_v3, %v41_v11 }
  0x17   :  { %v31_v15 = vmul.f32 %v30_v12, %v23_v0 }
  0x18   :  { %v43_v17 = vmul.f32 %v42_v14, %v24_v1 }
  0x19   :  { %v33_v18 = vsel %vm32_vm0, %v23_v0, %v31_v15 }
  0x1a   :  { %v36_v19 = vsel %vm34_vm1, %v35_v13, %v33_v18  ;;  %v45_v20 = vsel %vm44_vm2, %v24_v1, %v43_v17 }
  0x1b   :  { %49 = vst [vmem:[#allocation5] sm:$0xff] %v36_v19  ;;  %v48_v21 = vsel %vm46_vm3, %v47_v16, %v45_v20 }
  0x1c   :  { %50 = vst [vmem:[#allocation5 + $0x8] sm:$0xff] %v48_v21 }
  0x1d   :  { %61 = dma.vmem_to_hbm [thread:$0]  %s57_s11, 256, %s59_s14, [#allocation4]  }
  0x1e   :  { %124 = dma.done.wait [#allocation4], 256  }
  0x1f   :  { %125 = vsyncadd [#allocation4], 4294967040 }
  0x20   :  { %66 = vsyncpa [#allocation3], 1 }
  0x21   :  { %67 = vsyncpa [#allocation4], 1 }

</bundles_post_ra>
